<compile_context>
chip_gen: v7x
topology: tpu7x:2x2x1
jax: 0.10.0
libtpu: 0.0.40
codegen_flags: <defaults>
</compile_context>

<pallas_src>
import functools
import math

import jax
import jax.numpy as jnp
from jax.experimental import pallas as pl
from jax.experimental.pallas import tpu as pltpu

_LANE = 128
_VMEM_STEP_BUDGET = 8 * 1024 * 1024   # conservative per-grid-step VMEM budget (all gens)
_MIN_GRID_STEPS = 8                   # enough steps for 2-TC split + pipelining


def _round_up(x, m):
    return (x + m - 1) // m * m


def _round_down(x, m):
    return x // m * m


# --------------------------------------------------------------------------- #
# Kernel bodies
# --------------------------------------------------------------------------- #
def _layer_chain(h, param_refs, *, n_conv, k, has_bias, compute_dtype):
    """Fused Conv1d(+ReLU) stack.  h: (C_in, T) -> (C_out, T - n_conv*(K-1))."""
    step = 2 if has_bias else 1
    for li in range(n_conv):
        w = param_refs[step * li][...]                    # (C_out, K*C_in), VMEM-resident
        l_out = h.shape[1] - (k - 1)
        if k == 1:
            hk = h
        else:
            # Stack the K shifted tap windows along sublanes -> one MXU
            # contraction per layer instead of K dots + K-1 adds.
            hk = jnp.concatenate([h[:, j:j + l_out] for j in range(k)], axis=0)
        acc = jnp.dot(w, hk, preferred_element_type=jnp.float32)
        if has_bias:
            acc = acc + param_refs[step * li + 1][...]    # (C_out, 1), lane broadcast
        if li != n_conv - 1:                              # ReLU after all but last conv
            acc = jnp.maximum(acc, 0.0)
        h = acc.astype(compute_dtype)
    return h


def _convnet_kernel_k1(x_ref, *refs, n_conv, has_bias, n_params, compute_dtype):
    """K == 1 path: x_ref (C_in, TILE) auto-pipelined, lane-dense in and out."""
    o_ref = refs[n_params]
    h = x_ref[...].astype(compute_dtype)
    h = _layer_chain(h, refs[:n_params], n_conv=n_conv, k=1,
                     has_bias=has_bias, compute_dtype=compute_dtype)
    o_ref[...] = h.astype(o_ref.dtype)


def _convnet_kernel_halo(x_hbm, *refs, n_conv, k, has_bias, n_params, tile_out,
                         compute_dtype):
    """K > 1 path: overlapping (C_in, TILE_OUT + n_conv*(K-1)) window DMA'd
    manually from HBM per grid step (halo tiling); output auto-pipelined."""
    o_ref = refs[n_params]
    xbuf = refs[n_params + 1]
    sem = refs[n_params + 2]
    b = pl.program_id(0)
    l = pl.program_id(1)
    tile_in = xbuf.shape[-1]
    start = pl.multiple_of(l * tile_out, _LANE)           # tile_out is a 128 multiple
    copy = pltpu.make_async_copy(x_hbm.at[b, :, pl.ds(start, tile_in)], xbuf, sem)
    copy.start()
    copy.wait()
    # TODO(synk): double-buffer the halo-window DMA across grid steps to hide
    # the copy latency behind the previous step's compute.
    h = xbuf[...].astype(compute_dtype)
    h = _layer_chain(h, refs[:n_params], n_conv=n_conv, k=k,
                     has_bias=has_bias, compute_dtype=compute_dtype)
    o_ref[...] = h.astype(o_ref.dtype)


# --------------------------------------------------------------------------- #
# Tiling heuristics
# --------------------------------------------------------------------------- #
def _per_column_bytes(c_in, c_hidden, c_out, in_bytes, out_bytes):
    # 2x double-buffered input/output blocks + ~2 live intermediates (compute f32).
    return 2 * c_in * in_bytes + 2 * c_out * out_bytes + 2 * c_hidden * 4


def _pick_tile_k1(L, batch, col_bytes):
    if L <= _LANE:
        return L
    t_budget = max(_LANE, _round_down(_VMEM_STEP_BUDGET // col_bytes, _LANE))
    t_parallel = max(_LANE, _round_down(L * batch // _MIN_GRID_STEPS, _LANE))
    t = min(t_budget, t_parallel, _round_down(L, _LANE))
    # Largest lane-aligned tile that divides L exactly (keeps stores unmasked).
    for cand in range(t, _LANE - 1, -_LANE):
        if L % cand == 0:
            return cand
    return L   # odd L: single (un-pipelined) block per batch; still correct


def _pick_tile_out_halo(l_final, batch, col_bytes):
    t_budget = max(_LANE, _round_down(_VMEM_STEP_BUDGET // col_bytes, _LANE))
    t_parallel = max(_LANE, _round_down(l_final * batch // _MIN_GRID_STEPS, _LANE))
    return min(t_budget, t_parallel, _round_up(l_final, _LANE))


# --------------------------------------------------------------------------- #
# Wrapper
# --------------------------------------------------------------------------- #
def convnet_forward(x_ncl, weights, biases=None, *, kernel_size=1,
                    out_dtype=None, compute_dtype=jnp.float32):
    """ConvNet forward.  x_ncl: (B, C, L) (PyTorch NCW layout).

    weights: list of Conv1d weights, PyTorch layout (C_out, C_in, K).
    biases:  optional list of (C_out,) arrays (module default bias=False -> None).
    out_dtype: output dtype (default: x dtype).  compute_dtype: matmul operand
    dtype (default f32 to match the f32 PyTorch module; bf16 is an opt-in).
    """
    n_conv = len(weights)
    B, c_in0, L = x_ncl.shape
    K = kernel_size
    halo = n_conv * (K - 1)
    l_final = L - halo
    assert l_final > 0, "sequence too short for this kernel_size / depth"
    out_dtype = x_ncl.dtype if out_dtype is None else out_dtype
    has_bias = biases is not None
    c_out_last = weights[-1].shape[0]
    c_hidden = max(w.shape[0] for w in weights)

    # Params: (C_out, C_in, K) -> (C_out, K*C_in); tiny, constant index_map so
    # they are loaded to VMEM once and stay resident across grid steps.
    wb_args, wb_specs = [], []
    for li, w in enumerate(weights):
        c_out, c_in, k_w = w.shape
        assert k_w == K, (w.shape, K)
        w_flat = jnp.transpose(jnp.asarray(w), (0, 2, 1)).reshape(c_out, K * c_in)
        wb_args.append(w_flat.astype(compute_dtype))
        wb_specs.append(pl.BlockSpec((c_out, K * c_in), lambda b, l: (0, 0)))
        if has_bias:
            bt = jnp.asarray(biases[li], jnp.float32).reshape(c_out, 1)
            wb_args.append(bt)
            wb_specs.append(pl.BlockSpec((c_out, 1), lambda b, l: (0, 0)))
    n_params = len(wb_args)

    col_bytes = _per_column_bytes(c_in0, c_hidden, c_out_last,
                                  jnp.dtype(x_ncl.dtype).itemsize,
                                  jnp.dtype(out_dtype).itemsize)
    cparams = pltpu.CompilerParams(
        dimension_semantics=("parallel", "parallel"),
        vmem_limit_bytes=32 * 1024 * 1024)   # v5e scoped default is only 16 MiB

    if K == 1:
        # Every output column depends only on the same input column: tile L freely.
        tile = _pick_tile_k1(L, B, col_bytes)
        kern = functools.partial(_convnet_kernel_k1, n_conv=n_conv,
                                 has_bias=has_bias, n_params=n_params,
                                 compute_dtype=compute_dtype)
        return pl.pallas_call(
            kern,
            out_shape=jax.ShapeDtypeStruct((B, c_out_last, L), out_dtype),
            grid=(B, L // tile),
            in_specs=[pl.BlockSpec((None, c_in0, tile), lambda b, l: (b, 0, l))]
                     + wb_specs,
            out_specs=pl.BlockSpec((None, c_out_last, tile), lambda b, l: (b, 0, l)),
            compiler_params=cparams,
        )(x_ncl, *wb_args)

    # ---- K > 1: halo-tiled L axis (manual overlapping-window DMA) ---------- #
    tile_out = _pick_tile_out_halo(l_final, B, col_bytes)
    num_tiles = pl.cdiv(l_final, tile_out)
    l_out_pad = num_tiles * tile_out            # lane-dense, unmasked stores
    tile_in = tile_out + halo
    l_in_pad = l_out_pad + halo
    if l_in_pad > L:
        # Zero-pad the tail so every halo window stays in bounds; padded output
        # columns (>= l_final) are sliced off below.
        x_ncl = jnp.pad(x_ncl, ((0, 0), (0, 0), (0, l_in_pad - L)))

    kern = functools.partial(_convnet_kernel_halo, n_conv=n_conv, k=K,
                             has_bias=has_bias, n_params=n_params,
                             tile_out=tile_out, compute_dtype=compute_dtype)
    out = pl.pallas_call(
        kern,
        out_shape=jax.ShapeDtypeStruct((B, c_out_last, l_out_pad), out_dtype),
        grid=(B, num_tiles),
        in_specs=[pl.BlockSpec(memory_space=pl.ANY)] + wb_specs,
        out_specs=pl.BlockSpec((None, c_out_last, tile_out), lambda b, l: (b, 0, l)),
        scratch_shapes=[pltpu.VMEM((c_in0, tile_in), x_ncl.dtype),
                        pltpu.SemaphoreType.DMA(())],
        compiler_params=cparams,
    )(x_ncl, *wb_args)
    if l_out_pad != l_final:
        out = out[:, :, :l_final]
    return out


# --------------------------------------------------------------------------- #
# Pure-JAX reference (f32, matches the PyTorch module)
# --------------------------------------------------------------------------- #
def _reference_forward(x_ncl, weights, biases=None):
    h = jnp.asarray(x_ncl, jnp.float32)
    n_conv = len(weights)
    for li, w in enumerate(weights):
        w = jnp.asarray(w, jnp.float32)
        c_out, _, k = w.shape
        l_out = h.shape[2] - (k - 1)
        acc = jnp.zeros((h.shape[0], c_out, l_out), jnp.float32)
        for j in range(k):
            acc = acc + jnp.einsum("oc,bcl->bol", w[:, :, j], h[:, :, j:j + l_out])
        if biases is not None:
            acc = acc + jnp.asarray(biases[li], jnp.float32).reshape(1, c_out, 1)
        if li != n_conv - 1:
            acc = jnp.maximum(acc, 0.0)
        h = acc
    return h


if __name__ == "__main__":
    key = jax.random.PRNGKey(0)

    # --- Config 1: module defaults ConvNet(n_features=4) ---------------------
    #   kernel_size=1, n_hidden=8, n_layers=5, bias=False -> 6 Conv1d + 5 ReLU
    B, n_features, L = 2, 4, 1024
    n_hidden, n_layers, K = 8, 5, 1
    n_conv = n_layers + 1

    ks = jax.random.split(key, n_conv + 1)
    x = jax.random.normal(ks[0], (B, n_features, L), jnp.float32)
    weights = []
    c_in = n_features
    for i in range(n_conv):
        w = jax.random.normal(ks[i + 1], (n_hidden, c_in, K), jnp.float32)
        weights.append(w / math.sqrt(c_in * K))
        c_in = n_hidden

    out = jax.block_until_ready(convnet_forward(x, weights, kernel_size=K))
    assert out.shape == (B, n_hidden, L), out.shape
    ref = _reference_forward(x, weights)
    assert jnp.allclose(out, ref, rtol=1e-3, atol=1e-3), \
        float(jnp.max(jnp.abs(out - ref)))

    # bf16 output path (opt-in, cuts store-side HBM traffic ~2x)
    out_b16 = jax.block_until_ready(
        convnet_forward(x, weights, kernel_size=K, out_dtype=jnp.bfloat16))
    assert out_b16.dtype == jnp.bfloat16
    assert jnp.allclose(out_b16.astype(jnp.float32), ref, rtol=5e-2, atol=5e-2)

    # --- Config 2: kernel_size > 1 with bias (halo-tiled valid-conv path) ----
    B2, C2, L2, H2, NL2, K2 = 2, 4, 256, 8, 2, 3
    n_conv2 = NL2 + 1
    ks2 = jax.random.split(jax.random.PRNGKey(1), 2 * n_conv2 + 1)
    x2 = jax.random.normal(ks2[0], (B2, C2, L2), jnp.float32)
    weights2, biases2 = [], []
    c_in = C2
    for i in range(n_conv2):
        w = jax.random.normal(ks2[2 * i + 1], (H2, c_in, K2), jnp.float32)
        weights2.append(w / math.sqrt(c_in * K2))
        biases2.append(0.1 * jax.random.normal(ks2[2 * i + 2], (H2,), jnp.float32))
        c_in = H2
    out2 = jax.block_until_ready(
        convnet_forward(x2, weights2, biases2, kernel_size=K2))
    l_final2 = L2 - n_conv2 * (K2 - 1)
    assert out2.shape == (B2, H2, l_final2), out2.shape
    ref2 = _reference_forward(x2, weights2, biases2)
    assert jnp.allclose(out2, ref2, rtol=1e-3, atol=1e-3), \
        float(jnp.max(jnp.abs(out2 - ref2)))

    print("KERNEL_OK")
</pallas_src>

<mosaic_0001>
module attributes {stable_mosaic.version = 11 : i64} {
  func.func @_convnet_kernel_k1(%arg0: i32, %arg1: i32, %arg2: memref<1x4x256xf32, #tpu.memory_space<vmem>>, %arg3: memref<8x4xf32, #tpu.memory_space<vmem>>, %arg4: memref<8x8xf32, #tpu.memory_space<vmem>>, %arg5: memref<8x8xf32, #tpu.memory_space<vmem>>, %arg6: memref<8x8xf32, #tpu.memory_space<vmem>>, %arg7: memref<8x8xf32, #tpu.memory_space<vmem>>, %arg8: memref<8x8xf32, #tpu.memory_space<vmem>>, %arg9: memref<1x8x256xf32, #tpu.memory_space<vmem>>) attributes {dimension_semantics = [#tpu.dimension_semantics<parallel>, #tpu.dimension_semantics<parallel>], iteration_bounds = array<i64: 2, 4>, scalar_prefetch = 0 : i64, scratch_operands = 0 : i64, tpu.core_type = #tpu.core_type<tc>, window_params = [{transform_indices = @transform_0, window_bounds = array<i64: 1, 4, 256>}, {pipeline_mode = #tpu.pipeline_mode<synchronous>, transform_indices = @transform_1, window_bounds = array<i64: 8, 4>}, {pipeline_mode = #tpu.pipeline_mode<synchronous>, transform_indices = @transform_2, window_bounds = array<i64: 8, 8>}, {pipeline_mode = #tpu.pipeline_mode<synchronous>, transform_indices = @transform_3, window_bounds = array<i64: 8, 8>}, {pipeline_mode = #tpu.pipeline_mode<synchronous>, transform_indices = @transform_4, window_bounds = array<i64: 8, 8>}, {pipeline_mode = #tpu.pipeline_mode<synchronous>, transform_indices = @transform_5, window_bounds = array<i64: 8, 8>}, {pipeline_mode = #tpu.pipeline_mode<synchronous>, transform_indices = @transform_6, window_bounds = array<i64: 8, 8>}, {transform_indices = @transform_7, window_bounds = array<i64: 1, 8, 256>}]} {
    %c0 = arith.constant 0 : index
    %c0_0 = arith.constant 0 : index
    %c0_1 = arith.constant 0 : index
    %0 = vector.load %arg2[%c0, %c0_0, %c0_1] : memref<1x4x256xf32, #tpu.memory_space<vmem>>, vector<1x4x256xf32>
    %1 = vector.shape_cast %0 : vector<1x4x256xf32> to vector<4x256xf32>
    %c0_2 = arith.constant 0 : index
    %c0_3 = arith.constant 0 : index
    %2 = vector.load %arg3[%c0_2, %c0_3] : memref<8x4xf32, #tpu.memory_space<vmem>>, vector<8x4xf32>
    %cst = arith.constant dense<0.000000e+00> : vector<8x256xf32>
    %3 = tpu.matmul %2, %1, %cst {dimension_numbers = #tpu.dot_dimension_numbers<[1], [0], [0], [1], [0, 0, 1, 1], [], []>} : vector<8x4xf32>, vector<4x256xf32>, vector<8x256xf32> -> vector<8x256xf32>
    %cst_4 = arith.constant 0.000000e+00 : f32
    %4 = vector.broadcast %cst_4 : f32 to vector<8x256xf32>
    %5 = arith.maximumf %3, %4 : vector<8x256xf32>
    %c0_5 = arith.constant 0 : index
    %c0_6 = arith.constant 0 : index
    %6 = vector.load %arg4[%c0_5, %c0_6] : memref<8x8xf32, #tpu.memory_space<vmem>>, vector<8x8xf32>
    %cst_7 = arith.constant dense<0.000000e+00> : vector<8x256xf32>
    %7 = tpu.matmul %6, %5, %cst_7 {dimension_numbers = #tpu.dot_dimension_numbers<[1], [0], [0], [1], [0, 0, 1, 1], [], []>} : vector<8x8xf32>, vector<8x256xf32>, vector<8x256xf32> -> vector<8x256xf32>
    %cst_8 = arith.constant 0.000000e+00 : f32
    %8 = vector.broadcast %cst_8 : f32 to vector<8x256xf32>
    %9 = arith.maximumf %7, %8 : vector<8x256xf32>
    %c0_9 = arith.constant 0 : index
    %c0_10 = arith.constant 0 : index
    %10 = vector.load %arg5[%c0_9, %c0_10] : memref<8x8xf32, #tpu.memory_space<vmem>>, vector<8x8xf32>
    %cst_11 = arith.constant dense<0.000000e+00> : vector<8x256xf32>
    %11 = tpu.matmul %10, %9, %cst_11 {dimension_numbers = #tpu.dot_dimension_numbers<[1], [0], [0], [1], [0, 0, 1, 1], [], []>} : vector<8x8xf32>, vector<8x256xf32>, vector<8x256xf32> -> vector<8x256xf32>
    %cst_12 = arith.constant 0.000000e+00 : f32
    %12 = vector.broadcast %cst_12 : f32 to vector<8x256xf32>
    %13 = arith.maximumf %11, %12 : vector<8x256xf32>
    %c0_13 = arith.constant 0 : index
    %c0_14 = arith.constant 0 : index
    %14 = vector.load %arg6[%c0_13, %c0_14] : memref<8x8xf32, #tpu.memory_space<vmem>>, vector<8x8xf32>
    %cst_15 = arith.constant dense<0.000000e+00> : vector<8x256xf32>
    %15 = tpu.matmul %14, %13, %cst_15 {dimension_numbers = #tpu.dot_dimension_numbers<[1], [0], [0], [1], [0, 0, 1, 1], [], []>} : vector<8x8xf32>, vector<8x256xf32>, vector<8x256xf32> -> vector<8x256xf32>
    %cst_16 = arith.constant 0.000000e+00 : f32
    %16 = vector.broadcast %cst_16 : f32 to vector<8x256xf32>
    %17 = arith.maximumf %15, %16 : vector<8x256xf32>
    %c0_17 = arith.constant 0 : index
    %c0_18 = arith.constant 0 : index
    %18 = vector.load %arg7[%c0_17, %c0_18] : memref<8x8xf32, #tpu.memory_space<vmem>>, vector<8x8xf32>
    %cst_19 = arith.constant dense<0.000000e+00> : vector<8x256xf32>
    %19 = tpu.matmul %18, %17, %cst_19 {dimension_numbers = #tpu.dot_dimension_numbers<[1], [0], [0], [1], [0, 0, 1, 1], [], []>} : vector<8x8xf32>, vector<8x256xf32>, vector<8x256xf32> -> vector<8x256xf32>
    %cst_20 = arith.constant 0.000000e+00 : f32
    %20 = vector.broadcast %cst_20 : f32 to vector<8x256xf32>
    %21 = arith.maximumf %19, %20 : vector<8x256xf32>
    %c0_21 = arith.constant 0 : index
    %c0_22 = arith.constant 0 : index
    %22 = vector.load %arg8[%c0_21, %c0_22] : memref<8x8xf32, #tpu.memory_space<vmem>>, vector<8x8xf32>
    %cst_23 = arith.constant dense<0.000000e+00> : vector<8x256xf32>
    %23 = tpu.matmul %22, %21, %cst_23 {dimension_numbers = #tpu.dot_dimension_numbers<[1], [0], [0], [1], [0, 0, 1, 1], [], []>} : vector<8x8xf32>, vector<8x256xf32>, vector<8x256xf32> -> vector<8x256xf32>
    %c0_24 = arith.constant 0 : index
    %c0_25 = arith.constant 0 : index
    %c0_26 = arith.constant 0 : index
    %24 = vector.load %arg9[%c0_24, %c0_25, %c0_26] : memref<1x8x256xf32, #tpu.memory_space<vmem>>, vector<1x8x256xf32>
    %25 = vector.shape_cast %24 : vector<1x8x256xf32> to vector<8x256xf32>
    %26 = vector.shape_cast %23 : vector<8x256xf32> to vector<1x8x256xf32>
    tpu.vector_store %arg9[%c0_24, %c0_25, %c0_26], %26 {strides = array<i32>} : memref<1x8x256xf32, #tpu.memory_space<vmem>>, vector<1x8x256xf32>,
    return
  }
  func.func @transform_0(%arg0: i32, %arg1: i32) -> (i32, i32, i32) {
    %c0_i32 = arith.constant 0 : i32
    %c0_i32_0 = arith.constant 0 : i32
    return %arg0, %c0_i32, %arg1 : i32, i32, i32
  }
  func.func @transform_1(%arg0: i32, %arg1: i32) -> (i32, i32) {
    %c0_i32 = arith.constant 0 : i32
    %c0_i32_0 = arith.constant 0 : i32
    %c0_i32_1 = arith.constant 0 : i32
    return %c0_i32, %c0_i32_0 : i32, i32
  }
  func.func @transform_2(%arg0: i32, %arg1: i32) -> (i32, i32) {
    %c0_i32 = arith.constant 0 : i32
    %c0_i32_0 = arith.constant 0 : i32
    %c0_i32_1 = arith.constant 0 : i32
    return %c0_i32, %c0_i32_0 : i32, i32
  }
  func.func @transform_3(%arg0: i32, %arg1: i32) -> (i32, i32) {
    %c0_i32 = arith.constant 0 : i32
    %c0_i32_0 = arith.constant 0 : i32
    %c0_i32_1 = arith.constant 0 : i32
    return %c0_i32, %c0_i32_0 : i32, i32
  }
  func.func @transform_4(%arg0: i32, %arg1: i32) -> (i32, i32) {
    %c0_i32 = arith.constant 0 : i32
    %c0_i32_0 = arith.constant 0 : i32
    %c0_i32_1 = arith.constant 0 : i32
    return %c0_i32, %c0_i32_0 : i32, i32
  }
  func.func @transform_5(%arg0: i32, %arg1: i32) -> (i32, i32) {
    %c0_i32 = arith.constant 0 : i32
    %c0_i32_0 = arith.constant 0 : i32
    %c0_i32_1 = arith.constant 0 : i32
    return %c0_i32, %c0_i32_0 : i32, i32
  }
  func.func @transform_6(%arg0: i32, %arg1: i32) -> (i32, i32) {
    %c0_i32 = arith.constant 0 : i32
    %c0_i32_0 = arith.constant 0 : i32
    %c0_i32_1 = arith.constant 0 : i32
    return %c0_i32, %c0_i32_0 : i32, i32
  }
  func.func @transform_7(%arg0: i32, %arg1: i32) -> (i32, i32, i32) {
    %c0_i32 = arith.constant 0 : i32
    %c0_i32_0 = arith.constant 0 : i32
    return %arg0, %c0_i32, %arg1 : i32, i32, i32
  }
}

</mosaic_0001>

<bundles_post_ra>
// kernel: tpu_custom_call.1
= control target key start
LH: loop header
LB: loop body
LE: loop exit
PB: predicated region body
PF: predicated region fallthrough
CT: control target
= control target key end

     0   :  { %s1497_s0 = inlined_call_operand.hbm [shape: f32[2,4,1024], index: 0, kind: input, shape index: {}]   ;;  %s1498_s1 = inlined_call_operand.vmem [shape: f32[8,4], index: 1, kind: input, shape index: {}]   ;;  %s1499_s2 = inlined_call_operand.vmem [shape: f32[8,8], index: 2, kind: input, shape index: {}]   ;;  %s1500_s3 = inlined_call_operand.vmem [shape: f32[8,8], index: 3, kind: input, shape index: {}]   ;;  %s1501_s4 = inlined_call_operand.vmem [shape: f32[8,8], index: 4, kind: input, shape index: {}]   ;;  %s1502_s5 = inlined_call_operand.hbm [shape: f32[8,8], index: 5, kind: input, shape index: {}]   ;;  %s1503_s6 = inlined_call_operand.vmem [shape: f32[8,8], index: 6, kind: input, shape index: {}]   ;;  %s1504_s7 = inlined_call_operand.hbm [shape: f32[2,8,1024], index: 7, kind: output, shape index: {}]  }
   0x1   :  { %1517 = sst [smem:[#allocation17_spill]] %s1502_s5 }
   0x2   :  { %1518 = sst [smem:[#allocation18_spill]] %s1503_s6 }
   0x3   :  { %1519 = sst [smem:[#allocation19_spill]] %s1504_s7 }
   0x4   :  { %12 = vsyncpa [#allocation3], 0 }
   0x5   :  { %14 = vsyncpa [#allocation3 + $0x1], 0 }
   0x6   :  { %15 = vsyncpa [#allocation6], 0 }
   0x7   :  { %16 = vsyncpa [#allocation4], 0 }
   0x8   :  { %18 = vsyncpa [#allocation4 + $0x1], 0  ;;  %s1238_s24 = smov 0   ;;  %s1240_s25 = smov 0  }
   0x9   :  { %s1242_s26 = smov 0   ;;  %s1244_s27 = smov 0  }
   0xa   :  { %s1246_s28 = smov 0   ;;  %s1248_s29 = smov 0  }
   0xb   :  { %s1250_s30 = smov 0   ;;  %s1252_s8 = smov 0  }
   0xc LB: > { %1520 = sst [smem:[#allocation11_spill]] %s1164_s24  ;;  %s914_s9 = sadd.s32 4294967295, %s1192_s8   ;;  %s1192_s8 = sphi %s1252_s8, %s24_s8   ;;  %s1188_s30 = sphi %s1250_s30, %s1554_s30   ;;  %s1184_s29 = sphi %s1248_s29, %s1548_s29   ;;  %s1180_s28 = sphi %s1246_s28, %s1553_s28   ;;  %s1176_s27 = sphi %s1244_s27, %s1547_s27   ;;  %s1172_s26 = sphi %s1242_s26, %s1552_s26   ;;  %s1168_s25 = sphi %s1240_s25, %s1551_s25   ;;  %s1164_s24 = sphi %s1238_s24, %s1550_s24  }
   0xd   : > { %1521 = sst [smem:[#allocation12_spill]] %s1184_s29  ;;  %s915_s10 = sadd.s32 4294967294, %s1192_s8  }
   0xe   : > { %p58_p0 = scmp.ne.s32.totalorder %s1168_s25, %s1164_s24  ;;  %p1282_p1 = scmp.eq.s32.totalorder %s914_s9, 0 }
   0xf   : > { %p1286_p2 = scmp.eq.s32.totalorder %s914_s9, 7  ;;  %p216_p3 = scmp.eq.s32.totalorder %s915_s10, 7 }
  0x10   : > { %s1522_s11 = scalar_select %p1282_p1, 1, 0 }
  0x11   : > { %s1523_s12 = scalar_select %p1286_p2, 1, 0 }
  0x12   : > { %p1292_p4 = por %p1282_p1, %p58_p0  ;;  %p916_p5 = scmp.ge.s32.totalorder %s1192_s8, 1 }
  0x13   : > { %p1297_p6 = por %p216_p3, %p58_p0  ;;  %p223_p7 = scmp.lt.s32.totalorder %s1192_s8, 9 }
  0x14   : > { %s1524_s13 = scalar_select %p1292_p4, 1, 0 }
  0x15   : > { %s1525_s14 = scalar_select %p1297_p6, 1, 0 }
  0x16   : > { %p1302_p8 = pnand %p916_p5, %p223_p7  ;;  %s1194_s16 = smov [#allocation5]  }
  0x17   : > { %1526 = sst [smem:[#allocation13_spill]] %s1525_s14  ;;  %s248_s17 = sshll.u32 %s1194_s16, 4  ;;  %s249_s17 = int_to_ptr.vmem [resolvable:$true] %s248_s17 }
  0x18   : > { %s1527_s15 = scalar_select %p1302_p8, 1, 0 }
  0x19   : > { %p949_p9 = pneg %p1302_p8  ;;  %s33_s19 = sadd.s32 1, %s1184_s29 }
  0x1a   : > { %s1529_s5 = sld [smem:[#allocation17_spill]] }
  0x1b   : > { %p1310_p10 = pnand %p949_p9, %p1282_p1 }
  0x1d   : > { %p1034_p12 = pneg %p1310_p10 }
  0x20   : > { %s1032_s22 = scalar_lea.hbm %s1529_s5, 128 }
  0x21   : > { %p1033_p11 = scmp.ne.s32.totalorder %s1529_s5, %s1032_s22  ;;  %p1039_p3 = scmp.lt.u32.totalorder %s1032_s22, %s1529_s5 }
  0x23   : > { %p1035_p13 = pnand %p1034_p12, %p1033_p11 }
  0x25   : > { %p1036_p0 = pneg %p1035_p13 }
  0x27   : > { %p1041_p5 = pnand %p1039_p3, %p1036_p0 }
  0x29   : > { %1044 = shalt.err (!%p1041_p5)
}
  0x2a   : > { %s1045_s14 = scalar_lea.vmem %s249_s17, 128  ;;  %p1053_p1 = scmp.lt.s32.totalorder %s249_s17, %s249_s17 }
  0x2b   : > { %p1046_p7 = scmp.ne.s32.totalorder %s249_s17, %s1045_s14  ;;  %p1054_p4 = scmp.lt.s32.totalorder %s1045_s14, %s1045_s14 }
  0x2d   : > { %p1048_p9 = pnand %p1046_p7, %p1034_p12  ;;  %p1055_p8 = por %p1054_p4, %p1053_p1 }
  0x2f   : > { %p1049_p6 = pneg %p1048_p9 }
  0x31   : > { %p1056_p2 = pnand %p1055_p8, %p1049_p6 }
  0x33   : > { %1059 = shalt.err (!%p1056_p2)
}
  0x34   : > { %952 = dma.hbm_to_vmem [thread:$0]  (!%p1310_p10), %s1529_s5, 128, %s249_s17, [#allocation6]  }
  0x35   : > { %p34_p1 = scmp.ge.s32.totalorder %s33_s19, 4  ;;  %s36_s14 = sadd.s32 1, %s1188_s30 }
  0x36   : > { %s45_s22 = sadd.s32 1, %s1172_s26  ;;  %p52_p2 = scmp.ne.s32.totalorder %s1172_s26, %s1168_s25 }
  0x37   : > { %s1556_s19 = smov (%p34_p1, %s33_s19), 0  ;;  %s1558_s14 = smov (!%p34_p1, %s36_s14), %s1188_s30 }
  0x38   : > { %1530 = sst [smem:[#allocation14_spill]] %s1556_s19  ;;  %s41_s18 = ssub.s32 %s1184_s29, %s1556_s19 }
  0x39   : > { %p53_p4 = scmp.eq.s32.totalorder %s1192_s8, 0  ;;  %p38_p6 = scmp.ge.s32.totalorder %s1558_s14, 2 }
  0x3a   : > { %p1531_p8 = scmp.ne.s32.totalorder %s1523_s12, 0  ;;  %p962_p12 = scmp.lt.s32.totalorder %s1192_s8, 8 }
  0x3b   : > { %p1347_p10 = por %p53_p4, %p52_p2  ;;  %s1560_s14 = smov (%p38_p6, %s1558_s14), 0 }
  0x3c   : > { %p1343_p11 = por %p1531_p8, %p52_p2  ;;  %1535 = sst [smem:[#allocation16_spill]] %s1560_s14 }
  0x3d   : > { %s262_s9 = sand.u32 1, %s1172_s26   ;;  %s920_s10 = sshll.u32 %s1184_s29, 1 }
  0x3e   : > { %s1532_s23 = scalar_select %p1343_p11, 1, 0 }
  0x3f   : > { %s40_s16 = ssub.s32 %s1188_s30, %s1560_s14  ;;  %s919_s21 = sshll.u32 %s262_s9, 3 }
  0x40   : > { %1533 = sst [smem:[#allocation15_spill]] %s1532_s23  ;;  %s42_s20 = sor.u32 %s41_s18, %s40_s16 }
  0x41   : > { %p43_p13 = scmp.eq.s32.totalorder %s42_s20, 0  ;;  %s921_s12 = sshll.u32 %s1188_s30, 3 }
  0x42   : > { %s266_s5 = scalar_lea.vmem [#allocation2], %s919_s21  ;;  %s272_s7 = sadd.s32 %s921_s12, %s920_s10 }
  0x43   : > { %s276_s19 = sshll.u32 %s266_s5, 4  ;;  %s922_s23 = sshll.u32 %s272_s7, 6  ;;  %s1362_s19 = int_to_ptr.vmem [resolvable:$true] %s276_s19 }
  0x44   : > { %s1360_s24 = scalar_select %p43_p13, %s1172_s26, %s45_s22  }
  0x45   : > { %p1368_p0 = pnand %p962_p12, %p1347_p10  ;;  %s1375_s18 = scalar_lea.hbm %s1497_s0, %s922_s23 }
  0x46   : > { %s263_s5 = scalar_lea.sflag [#allocation3], %s262_s9  ;;  %s1060_s22 = scalar_lea.hbm %s1375_s18, 128 }
  0x47   : > { %p1061_p3 = scmp.ne.s32.totalorder %s1375_s18, %s1060_s22  ;;  %p1062_p5 = pneg %p1368_p0 }
  0x48   : > { %s1065_s29 = scalar_lea.hbm %s1497_s0, 1024  ;;  %p1066_p1 = scmp.lt.u32.totalorder %s1375_s18, %s1497_s0 }
  0x49   : > { %p1063_p7 = pnand %p1062_p5, %p1061_p3  ;;  %p1067_p2 = scmp.lt.u32.totalorder %s1065_s29, %s1060_s22 }
  0x4a   : > { %p1069_p6 = scmp.lt.u32.totalorder %s1060_s22, %s1375_s18 }
  0x4b   : > { %p1064_p9 = pneg %p1063_p7  ;;  %p1068_p4 = por %p1067_p2, %p1066_p1 }
  0x4d   : > { %p1070_p8 = por %p1069_p6, %p1068_p4 }
  0x4f   : > { %p1071_p10 = pnand %p1070_p8, %p1064_p9 }
  0x51   : > { %1074 = shalt.err (!%p1071_p10)
}
  0x52   : > { %s1075_s9 = scalar_lea.vmem %s1362_s19, 128  ;;  %s1195_s10 = smov [#allocation2]  }
  0x53   : > { %p1076_p12 = scmp.ne.s32.totalorder %s1362_s19, %s1075_s9  ;;  %s1080_s16 = sshll.u32 %s1195_s10, 4  ;;  %s1081_s16 = int_to_ptr.vmem [resolvable:$false] %s1080_s16 }
  0x54   : > { %s1082_s20 = scalar_lea.vmem %s1081_s16, 256  ;;  %p1083_p7 = scmp.lt.s32.totalorder %s1362_s19, %s1081_s16 }
  0x55   : > { %p1078_p13 = pnand %p1076_p12, %p1062_p5  ;;  %p1084_p1 = scmp.lt.s32.totalorder %s1082_s20, %s1075_s9 }
  0x57   : > { %p1079_p3 = pneg %p1078_p13  ;;  %p1085_p2 = por %p1084_p1, %p1083_p7 }
  0x59   : > { %p1086_p4 = pnand %p1085_p2, %p1079_p3 }
  0x5b   : > { %1089 = shalt.err (!%p1086_p4)
}
  0x5c   : > { %956 = dma.hbm_to_vmem [thread:$0]  (!%p1368_p0), %s1375_s18, 128, %s1362_s19, %s263_s5  }
  0x5d   : > { %p1537_p9 = scmp.ne.s32.totalorder %s1527_s15, 0 }
  0x5e   : > { %s1405_s21 = sand.u32 (!%p1537_p9), 1, %s1168_s25   ;;  %p1538_p5 = scmp.ne.s32.totalorder (!%p1537_p9), %s1524_s13, 0 }
  0x5f   : > { %285 = sbr.rel (%p1537_p9) target bundleno = 1423 (0x58f), region = 48  ;;  %s924_s12 = sshll.u32 (!%p1537_p9), %s1405_s21, 3 }
  0x60   : > { %s288_s22 = scalar_lea.sflag (!%p1537_p9), [#allocation3], %s1405_s21  ;;  %s291_s7 = scalar_lea.vmem (!%p1537_p9), [#allocation2], %s924_s12 }
  0x66   : > { %1151 = dma.done.wait (%p1538_p5), %s288_s22, 128  }
  0x67   : > { %1153 = vsyncadd (%p1538_p5), %s288_s22, 4294967168  ;;  %p1539_p6 = scmp.ne.s32.totalorder %s1522_s11, 0 }
  0x69   : > { %1155 = dma.done.wait (%p1539_p6), [#allocation6], 128  }
  0x6a   : > { %1157 = vsyncadd (%p1539_p6), [#allocation6], 4294967168  ;;  %v1196_v0 = vmov 0.0   ;;  %v328_v1 = vld [vmem:[%s291_s7] sm:$0xff]  ;;  %vm336_vm0 = vcmask 1043456   ;;  %vm332_vm1 = vcmask 31744  }
  0x6b   : > { %405 = vmatprep.mubr.f32.mxu0 %v1196_v0  ;;  %483 = vmatprep.mubr.f32.mxu1 %v1196_v0  ;;  %v331_v2 = vcombine.high %v328_v1, %v328_v1  ;;  %v329_v3 = vld [vmem:[%s1498_s1] sm:$0xff]  ;;  %vm415_vm2 = vcmask 64512   ;;  %v646_v23 = vld [vmem:[#allocation5] sm:$0xff]  ;;  %s1540_s23 = sld [smem:[#allocation18_spill]]  ;;  %s926_s9 = sshll.u32 %s1405_s21, 4 }
  0x6c   : > { %v414_v8 = vld [vmem:[%s1499_s2] sm:$0xff]  ;;  %s936_s16 = sshll.u32 %s1176_s27, 1  ;;  %s937_s20 = sshll.u32 %s1180_s28, 3 }
  0x6d   : > { %927 = vmatprep.subr.msk.mxu0 %vm336_vm0, %v331_v2  ;;  %v492_v13 = vld [vmem:[%s1500_s3] sm:$0xff]  ;;  %s813_s12 = sadd.s32 %s937_s20, %s936_s16  ;;  %s325_s22 = scalar_lea.vmem [#allocation7], %s926_s9 }
  0x6e   : > { %928 = vmatpush1.msk.msra.mxu0 %vm336_vm0, %v328_v1  ;;  %v569_v18 = vld [vmem:[%s1501_s4] sm:$0xff]  ;;  %s817_s7 = sshll.u32 %s325_s22, 4  ;;  %s938_s6 = sshll.u32 %s813_s12, 7  ;;  %s1440_s7 = int_to_ptr.vmem [resolvable:$true] %s817_s7 }
  0x6f   : > { %929 = vmatmul.mubr.msk.f32.vlgmr.msra.gmra.mrb[0].mxu0 %vm332_vm1, %v329_v3  ;;  %s1542_s13 = sld [smem:[#allocation19_spill]]  ;;  %s801_s27 = scalar_lea.sflag [#allocation4], %s1405_s21 }
  0x70   : > { %560 = vmatprep.mubr.f32.mxu0 %v1196_v0  ;;  %s1090_s28 = scalar_lea.vmem %s1440_s7, 256  ;;  %s1197_s18 = smov [#allocation7]  }
  0x71   : > { %v723_v28 = vld [vmem:[%s1540_s23] sm:$0xff]  ;;  %p1091_p0 = scmp.ne.s32.totalorder %s1440_s7, %s1090_s28  ;;  %s1094_s5 = sshll.u32 %s1197_s18, 4  ;;  %s1095_s5 = int_to_ptr.vmem [resolvable:$false] %s1094_s5 }
  0x72   : > { %s1096_s17 = scalar_lea.vmem %s1095_s5, 512  ;;  %p1097_p12 = scmp.lt.s32.totalorder %s1440_s7, %s1095_s5 }
  0x73   : > { %p1092_p8 = pnand %p1091_p0, %p1343_p11  ;;  %p1098_p13 = scmp.lt.s32.totalorder %s1096_s17, %s1090_s28 }
  0x75   : > { %s1445_s19 = scalar_lea.hbm %s1542_s13, %s938_s6  ;;  %p1093_p10 = pneg %p1092_p8 }
  0x76   : > { %p1099_p3 = por %p1098_p13, %p1097_p12 }
  0x78   : > { %p1100_p7 = pnand %p1099_p3, %p1093_p10 }
 0x142   : > { %v407_v4 = vpop.f32.mrb[0].mxu0 }
 0x143   : > { %v409_v5 = vpop.f32.mrb[1].mxu0  ;;  %v412_v7 = vmax.f32 %v407_v4, 0.0 }
 0x144   : > { %v413_v6 = vmax.f32 %v409_v5, 0.0 }
 0x146   : > { %419 = vmatprep.subr.mxu1 %v413_v6 }
 0x147   : > { %420 = vmatpush1.msra.mxu1 %v412_v7 }
 0x148   : > { %930 = vmatmul.mubr.msk.f32.vlgmr.msra.gmra.mrb[0].mxu1 %vm415_vm2, %v414_v8 }
 0x149   : > { %637 = vmatprep.mubr.f32.mxu1 %v1196_v0 }
 0x21b   : > { %v485_v9 = vpop.f32.mrb[0].mxu1 }
 0x21c   : > { %v487_v10 = vpop.f32.mrb[1].mxu1  ;;  %v490_v12 = vmax.f32 %v485_v9, 0.0 }
 0x21d   : > { %v491_v11 = vmax.f32 %v487_v10, 0.0 }
 0x21f   : > { %496 = vmatprep.subr.mxu0 %v491_v11 }
 0x220   : > { %497 = vmatpush1.msra.mxu0 %v490_v12 }
 0x221   : > { %931 = vmatmul.mubr.msk.f32.vlgmr.msra.gmra.mrb[2].mxu0 %vm415_vm2, %v492_v13 }
 0x222   : > { %714 = vmatprep.mubr.f32.mxu0 %v1196_v0 }
 0x2f4   : > { %v562_v14 = vpop.f32.mrb[2].mxu0 }
 0x2f5   : > { %v564_v15 = vpop.f32.mrb[3].mxu0  ;;  %v567_v17 = vmax.f32 %v562_v14, 0.0 }
 0x2f6   : > { %v568_v16 = vmax.f32 %v564_v15, 0.0 }
 0x2f8   : > { %573 = vmatprep.subr.mxu1 %v568_v16 }
 0x2f9   : > { %574 = vmatpush1.msra.mxu1 %v567_v17 }
 0x2fa   : > { %932 = vmatmul.mubr.msk.f32.vlgmr.msra.gmra.mrb[2].mxu1 %vm415_vm2, %v569_v18 }
 0x2fb   : > { %791 = vmatprep.mubr.f32.mxu1 %v1196_v0 }
 0x3cd   : > { %v639_v19 = vpop.f32.mrb[2].mxu1 }
 0x3ce   : > { %v641_v20 = vpop.f32.mrb[3].mxu1  ;;  %v644_v22 = vmax.f32 %v639_v19, 0.0 }
 0x3cf   : > { %v645_v21 = vmax.f32 %v641_v20, 0.0 }
 0x3d1   : > { %650 = vmatprep.subr.mxu0 %v645_v21 }
 0x3d2   : > { %651 = vmatpush1.msra.mxu0 %v644_v22 }
 0x3d3   : > { %933 = vmatmul.mubr.msk.f32.vlgmr.msra.gmra.mrb[4].mxu0 %vm415_vm2, %v646_v23 }
 0x4a6   : > { %v716_v24 = vpop.f32.mrb[4].mxu0 }
 0x4a7   : > { %v718_v25 = vpop.f32.mrb[5].mxu0  ;;  %v721_v27 = vmax.f32 %v716_v24, 0.0 }
 0x4a8   : > { %v722_v26 = vmax.f32 %v718_v25, 0.0 }
 0x4aa   : > { %727 = vmatprep.subr.mxu1 %v722_v26 }
 0x4ab   : > { %728 = vmatpush1.msra.mxu1 %v721_v27 }
 0x4ac   : > { %934 = vmatmul.mubr.msk.f32.vlgmr.msra.gmra.mrb[4].mxu1 %vm415_vm2, %v723_v28 }
 0x57f   : > { %v793_v29 = vpop.f32.mrb[4].mxu1 }
 0x580   : > { %798 = vst [vmem:[%s325_s22] sm:$0xff] %v793_v29  ;;  %v795_v30 = vpop.f32.mrb[5].mxu1 }
 0x581   : > { %799 = vst [vmem:[%s325_s22 + $0x8] sm:$0xff] %v795_v30 }
 0x582   : > { %1103 = shalt.err (!%p1100_p7)
}
 0x583   : > { %s1104_s21 = scalar_lea.hbm %s1445_s19, 256  ;;  %s1108_s23 = scalar_lea.hbm %s1542_s13, 2048 }
 0x584   : > { %p1105_p1 = scmp.ne.s32.totalorder %s1445_s19, %s1104_s21  ;;  %p1109_p9 = scmp.lt.u32.totalorder %s1445_s19, %s1542_s13 }
 0x585   : > { %p1110_p5 = scmp.lt.u32.totalorder %s1108_s23, %s1104_s21  ;;  %p1112_p0 = scmp.lt.u32.totalorder %s1104_s21, %s1445_s19 }
 0x586   : > { %p1106_p2 = pnand %p1105_p1, %p1343_p11 }
 0x587   : > { %p1111_p6 = por %p1110_p5, %p1109_p9 }
 0x588   : > { %p1107_p4 = pneg %p1106_p2 }
 0x589   : > { %p1113_p8 = por %p1112_p0, %p1111_p6 }
 0x58b   : > { %p1114_p10 = pnand %p1113_p8, %p1107_p4 }
 0x58d   : > { %1117 = shalt.err (!%p1114_p10)
}
 0x58e   : > { %947 = dma.vmem_to_hbm [thread:$0]  (%p1343_p11), %s1440_s7, 256, %s1445_s19, %s801_s27  }
 0x58f PF: > { %s1543_s20 = sld [smem:[#allocation11_spill]]  ;;  %s1544_s12 = sld [smem:[#allocation13_spill]] }
 0x590   : > { %p964_p12 = scmp.ge.s32.totalorder %s1192_s8, 2 }
 0x595   : > { %s829_s22 = sand.u32 1, %s1543_s20   ;;  %p1545_p13 = scmp.ne.s32.totalorder %s1544_s12, 0 }
 0x596   : > { %s830_s6 = scalar_lea.sflag [#allocation4], %s829_s22 }
 0x597   : > { %p958_p3 = pnand %p964_p12, %p1545_p13 }
 0x599   : > { %1159 = dma.done.wait (!%p958_p3), %s830_s6, 256  }
 0x59a   : > { %1161 = vsyncadd (!%p958_p3), %s830_s6, 4294967040  ;;  %s24_s8 = sadd.s32 1, %s1192_s8   ;;  %s1546_s10 = smov %s1360_s24 }
 0x59b   : > { %p21_p7 = scmp.ge.s32.totalorder %s24_s8, 10   ;;  %s1547_s27 = sld [smem:[#allocation12_spill]] }
 0x59c   : > { %s1548_s29 = sld [smem:[#allocation14_spill]]  ;;  %s1549_s7 = sld [smem:[#allocation16_spill]] }
 0x59d   : > { %s1550_s24 = smov %s1168_s25  ;;  %s1551_s25 = smov %s1172_s26 }
 0x59e   : > { %s1552_s26 = smov %s1546_s10  ;;  %s1553_s28 = smov %s1188_s30 }
 0x59f   :  { %23 = sbr.rel (!%p21_p7) target bundleno = 12 (0xc), region = 97 }
 0x5a2   : > { %s1554_s30 = smov %s1549_s7 }
 0x5a6   :  { %835 = vsyncpa [#allocation3], 1 }
 0x5a7   :  { %837 = vsyncpa [#allocation3 + $0x1], 1 }
 0x5a8   :  { %838 = vsyncpa [#allocation6], 1 }
 0x5a9   :  { %839 = vsyncpa [#allocation4], 1 }
 0x5aa   :  { %841 = vsyncpa [#allocation4 + $0x1], 1 }

</bundles_post_ra>
